<compile_context>
chip_gen: v6e
topology: v6e:2x2x1
jax: 0.10.0
libtpu: 0.0.40
codegen_flags: <defaults>
</compile_context>

<pallas_src>
import math
import jax
import jax.numpy as jnp
from jax import lax
from jax.experimental import pallas as pl
from jax.experimental.pallas import tpu as pltpu

# ---- model hyperparameters (small, synthetic) ----
C_IN = 32
C_HIDDEN = 32
NO_BLOCKS = 2
NO_ANGLES = 4
EPS = 1e-8
OUT_DIM = NO_ANGLES * 2        # 8
MERGED_DIM = 2 * OUT_DIM       # 16 : [unnormalized | normalized]

BATCH = 2
SEQ = 8

MAX_TM = 512   # rows per grid step cap (vreg live-range bound); tiles are balanced below


def angle_resnet_kernel(
    x_ref,                       # [TM, 2*C_IN] bf16 = concat(s, s_initial) along features
    w_front_ref, b_front_ref,    # fused linear_in/linear_initial: [2*C_IN, H] bf16, [1, H] f32
    w1_ref, b1_ref, w2_ref, b2_ref,   # stacked resnet-block params (w bf16, b f32)
    w_out_ref, b_out_ref,        # [H, OUT_DIM] bf16, [1, OUT_DIM] f32
    w_outp_ref, b_outp_ref,      # same, with (x, y) columns pairwise swapped
    merged_ref,                  # [TM, MERGED_DIM] f32 output: [unnorm | norm]
):
    # Fused front end:
    #   relu(s) @ w_in + relu(s_initial) @ w_initial + (b_in + b_initial)
    # relu is elementwise, so relu(concat(s, si)) == concat(relu(s), relu(si)).
    # ReLU in f32, cast to bf16 only for the MXU operand.
    x = jnp.maximum(x_ref[...].astype(jnp.float32), 0.0).astype(jnp.bfloat16)
    a = jnp.dot(x, w_front_ref[...], preferred_element_type=jnp.float32) + b_front_ref[...]

    # resnet blocks (static unroll over NO_BLOCKS)
    for blk in range(NO_BLOCKS):
        res = a
        t = jnp.maximum(a, 0.0).astype(jnp.bfloat16)
        t = jnp.dot(t, w1_ref[blk], preferred_element_type=jnp.float32) + b1_ref[blk]
        t = jnp.maximum(t, 0.0).astype(jnp.bfloat16)
        t = jnp.dot(t, w2_ref[blk], preferred_element_type=jnp.float32) + b2_ref[blk]
        a = res + t

    # s = linear_out(relu(s)); also produce the pair-partner columns from the same
    # lhs (w_out with x<->y columns swapped) so the pair norm needs no extra MXU
    # pass and no cross-lane movement.
    ar = jnp.maximum(a, 0.0).astype(jnp.bfloat16)
    out = jnp.dot(ar, w_out_ref[...], preferred_element_type=jnp.float32) + b_out_ref[...]
    par = jnp.dot(ar, w_outp_ref[...], preferred_element_type=jnp.float32) + b_outp_ref[...]

    # denom_sq[:, 2j] == denom_sq[:, 2j+1] == x_j^2 + y_j^2
    denom_sq = out * out + par * par
    inv = lax.rsqrt(jnp.maximum(denom_sq, EPS))   # EUP rsqrt; divide -> multiply
    normed = out * inv

    # all compute done; stores last, into one merged output block
    merged_ref[:, :OUT_DIM] = out
    merged_ref[:, OUT_DIM:] = normed


def init_params(key):
    """Deterministic synthetic parameters (f32 masters). Weights (in, out); biases (1, out)."""
    ks = jax.random.split(key, 12)

    def w(k, fan_in, fan_out, scale=None):
        scale = scale if scale is not None else 1.0 / math.sqrt(fan_in)
        return (scale * jax.random.normal(k, (fan_in, fan_out))).astype(jnp.float32)

    params = dict(
        w_initial=w(ks[0], C_IN, C_HIDDEN),
        b_initial=(0.01 * jax.random.normal(ks[1], (1, C_HIDDEN))).astype(jnp.float32),
        w_in=w(ks[2], C_IN, C_HIDDEN),
        b_in=(0.01 * jax.random.normal(ks[3], (1, C_HIDDEN))).astype(jnp.float32),
        # stacked resnet-block weights: [no_blocks, H, H] and biases [no_blocks, 1, H]
        w1=jnp.stack([w(k, C_HIDDEN, C_HIDDEN) for k in jax.random.split(ks[4], NO_BLOCKS)]),
        b1=(0.01 * jax.random.normal(ks[5], (NO_BLOCKS, 1, C_HIDDEN))).astype(jnp.float32),
        # 'final' init in OpenFold is zeros; keep small-but-nonzero for a nontrivial test
        w2=jnp.stack([w(k, C_HIDDEN, C_HIDDEN, scale=0.02) for k in jax.random.split(ks[6], NO_BLOCKS)]),
        b2=(0.01 * jax.random.normal(ks[7], (NO_BLOCKS, 1, C_HIDDEN))).astype(jnp.float32),
        w_out=w(ks[8], C_HIDDEN, OUT_DIM),
        b_out=(0.01 * jax.random.normal(ks[9], (1, OUT_DIM))).astype(jnp.float32),
    )
    return params


def _choose_tm(n):
    """Balanced, 16-aligned row tiles; even tile count for large n (v7x megacore parity)."""
    n_tiles = pl.cdiv(n, MAX_TM)
    if n_tiles > 1 and n_tiles % 2 == 1:
        n_tiles += 1
    tm = ((pl.cdiv(n, n_tiles) + 15) // 16) * 16
    return max(16, tm)


def angle_resnet(s, s_initial, params):
    lead = s.shape[:-1]
    n = math.prod(lead)
    s2 = s.reshape(n, C_IN)
    si2 = s_initial.reshape(n, C_IN)

    bf16 = jnp.bfloat16

    # --- host-side prep (free under XLA) ---
    # fused front-end input / weights; bf16 matmul operands (f32 biases & accumulation)
    x = jnp.concatenate([s2, si2], axis=-1).astype(bf16)                          # [n, 2*C_IN]
    w_front = jnp.concatenate([params["w_in"], params["w_initial"]], axis=0).astype(bf16)
    b_front = params["b_in"] + params["b_initial"]                                # [1, H] f32
    w1 = params["w1"].astype(bf16)
    w2 = params["w2"].astype(bf16)
    w_out = params["w_out"].astype(bf16)
    b_out = params["b_out"]
    # pairwise (x <-> y) column-swapped copies for the in-kernel pair norm
    perm = jnp.arange(OUT_DIM) ^ 1                                                # [1,0,3,2,5,4,7,6]
    w_outp = w_out[:, perm]
    b_outp = b_out[:, perm]

    # --- tiling: balanced, sublane-aligned, padded tail ---
    tm = _choose_tm(n)
    grid_m = pl.cdiv(n, tm)
    n_pad = grid_m * tm
    if n_pad != n:
        x = jnp.pad(x, ((0, n_pad - n), (0, 0)))
    grid = (grid_m,)

    row_spec_in = pl.BlockSpec((tm, 2 * C_IN), lambda i: (i, 0))
    row_spec_out = pl.BlockSpec((tm, MERGED_DIM), lambda i: (i, 0))
    full = lambda arr: pl.BlockSpec(arr.shape, lambda i: (0,) * arr.ndim)

    in_specs = [
        row_spec_in,
        full(w_front), full(b_front),
        full(w1), full(params["b1"]),
        full(w2), full(params["b2"]),
        full(w_out), full(b_out),
        full(w_outp), full(b_outp),
    ]

    merged = pl.pallas_call(
        angle_resnet_kernel,
        out_shape=jax.ShapeDtypeStruct((n_pad, MERGED_DIM), jnp.float32),
        grid_spec=pltpu.PrefetchScalarGridSpec(
            num_scalar_prefetch=0,
            grid=grid,
            in_specs=in_specs,
            out_specs=row_spec_out,
        ),
        compiler_params=pltpu.CompilerParams(
            dimension_semantics=("parallel",),
        ),
    )(
        x, w_front, b_front,
        w1, params["b1"],
        w2, params["b2"],
        w_out, b_out,
        w_outp, b_outp,
    )

    merged = merged[:n]
    unnorm = merged[:, :OUT_DIM].reshape(lead + (NO_ANGLES, 2))
    norm = merged[:, OUT_DIM:].reshape(lead + (NO_ANGLES, 2))
    return unnorm, norm


def angle_resnet_ref(s, s_initial, p):
    """Pure-JAX reference mirroring the PyTorch forward (bf16 matmul operands,
    f32 accumulation, to match the kernel's MXU numerics)."""
    bf16 = jnp.bfloat16

    def dot(x, w):
        return jnp.dot(x.astype(bf16), w.astype(bf16), preferred_element_type=jnp.float32)

    # inputs are handed to the kernel as bf16; mirror that
    s = s.astype(bf16).astype(jnp.float32)
    s_initial = s_initial.astype(bf16).astype(jnp.float32)

    si = dot(jnp.maximum(s_initial, 0.0), p["w_initial"]) + p["b_initial"][0]
    a = dot(jnp.maximum(s, 0.0), p["w_in"]) + p["b_in"][0]
    a = a + si
    for blk in range(NO_BLOCKS):
        res = a
        t = dot(jnp.maximum(a, 0.0), p["w1"][blk]) + p["b1"][blk, 0]
        t = dot(jnp.maximum(t, 0.0), p["w2"][blk]) + p["b2"][blk, 0]
        a = res + t
    a = jnp.maximum(a, 0.0)
    out = dot(a, p["w_out"]) + p["b_out"][0]
    out = out.reshape(out.shape[:-1] + (NO_ANGLES, 2))
    denom = jnp.sqrt(jnp.clip(jnp.sum(out ** 2, axis=-1, keepdims=True), min=EPS))
    return out, out / denom


if __name__ == "__main__":
    key = jax.random.PRNGKey(0)
    k_s, k_si, k_p = jax.random.split(key, 3)

    s = jax.random.normal(k_s, (BATCH, SEQ, C_IN), dtype=jnp.float32)
    s_initial = jax.random.normal(k_si, (BATCH, SEQ, C_IN), dtype=jnp.float32)
    params = init_params(k_p)

    unnorm, norm = angle_resnet(s, s_initial, params)
    jax.block_until_ready((unnorm, norm))

    ref_unnorm, ref_norm = angle_resnet_ref(s, s_initial, params)
    assert unnorm.shape == (BATCH, SEQ, NO_ANGLES, 2)
    assert norm.shape == (BATCH, SEQ, NO_ANGLES, 2)
    assert jnp.allclose(unnorm, ref_unnorm, atol=2e-3, rtol=2e-3)
    assert jnp.allclose(norm, ref_norm, atol=2e-3, rtol=2e-3)

    print("KERNEL_OK")
</pallas_src>

<mosaic_0001>
module attributes {stable_mosaic.version = 11 : i64} {
  func.func @angle_resnet_kernel(%arg0: i32, %arg1: memref<16x64xbf16, #tpu.memory_space<vmem>>, %arg2: memref<64x32xbf16, #tpu.memory_space<vmem>>, %arg3: memref<1x32xf32, #tpu.memory_space<vmem>>, %arg4: memref<2x32x32xbf16, #tpu.memory_space<vmem>>, %arg5: memref<2x1x32xf32, #tpu.memory_space<vmem>>, %arg6: memref<2x32x32xbf16, #tpu.memory_space<vmem>>, %arg7: memref<2x1x32xf32, #tpu.memory_space<vmem>>, %arg8: memref<32x8xbf16, #tpu.memory_space<vmem>>, %arg9: memref<1x8xf32, #tpu.memory_space<vmem>>, %arg10: memref<32x8xbf16, #tpu.memory_space<vmem>>, %arg11: memref<1x8xf32, #tpu.memory_space<vmem>>, %arg12: memref<16x16xf32, #tpu.memory_space<vmem>>) attributes {dimension_semantics = [#tpu.dimension_semantics<parallel>], iteration_bounds = array<i64: 1>, scalar_prefetch = 0 : i64, scratch_operands = 0 : i64, tpu.core_type = #tpu.core_type<tc>, window_params = [{transform_indices = @transform_0, window_bounds = array<i64: 16, 64>}, {pipeline_mode = #tpu.pipeline_mode<synchronous>, transform_indices = @transform_1, window_bounds = array<i64: 64, 32>}, {pipeline_mode = #tpu.pipeline_mode<synchronous>, transform_indices = @transform_2, window_bounds = array<i64: 1, 32>}, {pipeline_mode = #tpu.pipeline_mode<synchronous>, transform_indices = @transform_3, window_bounds = array<i64: 2, 32, 32>}, {pipeline_mode = #tpu.pipeline_mode<synchronous>, transform_indices = @transform_4, window_bounds = array<i64: 2, 1, 32>}, {pipeline_mode = #tpu.pipeline_mode<synchronous>, transform_indices = @transform_5, window_bounds = array<i64: 2, 32, 32>}, {pipeline_mode = #tpu.pipeline_mode<synchronous>, transform_indices = @transform_6, window_bounds = array<i64: 2, 1, 32>}, {pipeline_mode = #tpu.pipeline_mode<synchronous>, transform_indices = @transform_7, window_bounds = array<i64: 32, 8>}, {pipeline_mode = #tpu.pipeline_mode<synchronous>, transform_indices = @transform_8, window_bounds = array<i64: 1, 8>}, {pipeline_mode = #tpu.pipeline_mode<synchronous>, transform_indices = @transform_9, window_bounds = array<i64: 32, 8>}, {pipeline_mode = #tpu.pipeline_mode<synchronous>, transform_indices = @transform_10, window_bounds = array<i64: 1, 8>}, {transform_indices = @transform_11, window_bounds = array<i64: 16, 16>}]} {
    %c0 = arith.constant 0 : index
    %c0_0 = arith.constant 0 : index
    %0 = vector.load %arg1[%c0, %c0_0] : memref<16x64xbf16, #tpu.memory_space<vmem>>, vector<16x64xbf16>
    %1 = arith.extf %0 : vector<16x64xbf16> to vector<16x64xf32>
    %cst = arith.constant 0.000000e+00 : f32
    %2 = vector.broadcast %cst : f32 to vector<16x64xf32>
    %3 = arith.maximumf %1, %2 : vector<16x64xf32>
    %4 = arith.truncf %3 : vector<16x64xf32> to vector<16x64xbf16>
    %c0_1 = arith.constant 0 : index
    %c0_2 = arith.constant 0 : index
    %5 = vector.load %arg2[%c0_1, %c0_2] : memref<64x32xbf16, #tpu.memory_space<vmem>>, vector<64x32xbf16>
    %cst_3 = arith.constant dense<0.000000e+00> : vector<16x32xf32>
    %6 = tpu.matmul %4, %5, %cst_3 {dimension_numbers = #tpu.dot_dimension_numbers<[1], [0], [0], [1], [0, 0, 1, 1], [], []>} : vector<16x64xbf16>, vector<64x32xbf16>, vector<16x32xf32> -> vector<16x32xf32>
    %c0_4 = arith.constant 0 : index
    %c0_5 = arith.constant 0 : index
    %7 = vector.load %arg3[%c0_4, %c0_5] : memref<1x32xf32, #tpu.memory_space<vmem>>, vector<1x32xf32>
    %8 = vector.broadcast %7 : vector<1x32xf32> to vector<16x32xf32>
    %9 = arith.addf %6, %8 : vector<16x32xf32>
    %cst_6 = arith.constant 0.000000e+00 : f32
    %10 = vector.broadcast %cst_6 : f32 to vector<16x32xf32>
    %11 = arith.maximumf %9, %10 : vector<16x32xf32>
    %12 = arith.truncf %11 : vector<16x32xf32> to vector<16x32xbf16>
    %c0_7 = arith.constant 0 : index
    %c0_8 = arith.constant 0 : index
    %c0_9 = arith.constant 0 : index
    %13 = vector.load %arg4[%c0_7, %c0_8, %c0_9] : memref<2x32x32xbf16, #tpu.memory_space<vmem>>, vector<1x32x32xbf16>
    %14 = vector.shape_cast %13 : vector<1x32x32xbf16> to vector<32x32xbf16>
    %cst_10 = arith.constant dense<0.000000e+00> : vector<16x32xf32>
    %15 = tpu.matmul %12, %14, %cst_10 {dimension_numbers = #tpu.dot_dimension_numbers<[1], [0], [0], [1], [0, 0, 1, 1], [], []>} : vector<16x32xbf16>, vector<32x32xbf16>, vector<16x32xf32> -> vector<16x32xf32>
    %c0_11 = arith.constant 0 : index
    %c0_12 = arith.constant 0 : index
    %c0_13 = arith.constant 0 : index
    %16 = vector.load %arg5[%c0_11, %c0_12, %c0_13] : memref<2x1x32xf32, #tpu.memory_space<vmem>>, vector<1x1x32xf32>
    %17 = vector.shape_cast %16 : vector<1x1x32xf32> to vector<1x32xf32>
    %18 = vector.broadcast %17 : vector<1x32xf32> to vector<16x32xf32>
    %19 = arith.addf %15, %18 : vector<16x32xf32>
    %cst_14 = arith.constant 0.000000e+00 : f32
    %20 = vector.broadcast %cst_14 : f32 to vector<16x32xf32>
    %21 = arith.maximumf %19, %20 : vector<16x32xf32>
    %22 = arith.truncf %21 : vector<16x32xf32> to vector<16x32xbf16>
    %c0_15 = arith.constant 0 : index
    %c0_16 = arith.constant 0 : index
    %c0_17 = arith.constant 0 : index
    %23 = vector.load %arg6[%c0_15, %c0_16, %c0_17] : memref<2x32x32xbf16, #tpu.memory_space<vmem>>, vector<1x32x32xbf16>
    %24 = vector.shape_cast %23 : vector<1x32x32xbf16> to vector<32x32xbf16>
    %cst_18 = arith.constant dense<0.000000e+00> : vector<16x32xf32>
    %25 = tpu.matmul %22, %24, %cst_18 {dimension_numbers = #tpu.dot_dimension_numbers<[1], [0], [0], [1], [0, 0, 1, 1], [], []>} : vector<16x32xbf16>, vector<32x32xbf16>, vector<16x32xf32> -> vector<16x32xf32>
    %c0_19 = arith.constant 0 : index
    %c0_20 = arith.constant 0 : index
    %c0_21 = arith.constant 0 : index
    %26 = vector.load %arg7[%c0_19, %c0_20, %c0_21] : memref<2x1x32xf32, #tpu.memory_space<vmem>>, vector<1x1x32xf32>
    %27 = vector.shape_cast %26 : vector<1x1x32xf32> to vector<1x32xf32>
    %28 = vector.broadcast %27 : vector<1x32xf32> to vector<16x32xf32>
    %29 = arith.addf %25, %28 : vector<16x32xf32>
    %30 = arith.addf %9, %29 : vector<16x32xf32>
    %cst_22 = arith.constant 0.000000e+00 : f32
    %31 = vector.broadcast %cst_22 : f32 to vector<16x32xf32>
    %32 = arith.maximumf %30, %31 : vector<16x32xf32>
    %33 = arith.truncf %32 : vector<16x32xf32> to vector<16x32xbf16>
    %c1 = arith.constant 1 : index
    %c0_23 = arith.constant 0 : index
    %c0_24 = arith.constant 0 : index
    %34 = vector.load %arg4[%c1, %c0_23, %c0_24] : memref<2x32x32xbf16, #tpu.memory_space<vmem>>, vector<1x32x32xbf16>
    %35 = vector.shape_cast %34 : vector<1x32x32xbf16> to vector<32x32xbf16>
    %cst_25 = arith.constant dense<0.000000e+00> : vector<16x32xf32>
    %36 = tpu.matmul %33, %35, %cst_25 {dimension_numbers = #tpu.dot_dimension_numbers<[1], [0], [0], [1], [0, 0, 1, 1], [], []>} : vector<16x32xbf16>, vector<32x32xbf16>, vector<16x32xf32> -> vector<16x32xf32>
    %c1_26 = arith.constant 1 : index
    %c0_27 = arith.constant 0 : index
    %c0_28 = arith.constant 0 : index
    %37 = vector.load %arg5[%c1_26, %c0_27, %c0_28] : memref<2x1x32xf32, #tpu.memory_space<vmem>>, vector<1x1x32xf32>
    %38 = vector.shape_cast %37 : vector<1x1x32xf32> to vector<1x32xf32>
    %39 = vector.broadcast %38 : vector<1x32xf32> to vector<16x32xf32>
    %40 = arith.addf %36, %39 : vector<16x32xf32>
    %cst_29 = arith.constant 0.000000e+00 : f32
    %41 = vector.broadcast %cst_29 : f32 to vector<16x32xf32>
    %42 = arith.maximumf %40, %41 : vector<16x32xf32>
    %43 = arith.truncf %42 : vector<16x32xf32> to vector<16x32xbf16>
    %c1_30 = arith.constant 1 : index
    %c0_31 = arith.constant 0 : index
    %c0_32 = arith.constant 0 : index
    %44 = vector.load %arg6[%c1_30, %c0_31, %c0_32] : memref<2x32x32xbf16, #tpu.memory_space<vmem>>, vector<1x32x32xbf16>
    %45 = vector.shape_cast %44 : vector<1x32x32xbf16> to vector<32x32xbf16>
    %cst_33 = arith.constant dense<0.000000e+00> : vector<16x32xf32>
    %46 = tpu.matmul %43, %45, %cst_33 {dimension_numbers = #tpu.dot_dimension_numbers<[1], [0], [0], [1], [0, 0, 1, 1], [], []>} : vector<16x32xbf16>, vector<32x32xbf16>, vector<16x32xf32> -> vector<16x32xf32>
    %c1_34 = arith.constant 1 : index
    %c0_35 = arith.constant 0 : index
    %c0_36 = arith.constant 0 : index
    %47 = vector.load %arg7[%c1_34, %c0_35, %c0_36] : memref<2x1x32xf32, #tpu.memory_space<vmem>>, vector<1x1x32xf32>
    %48 = vector.shape_cast %47 : vector<1x1x32xf32> to vector<1x32xf32>
    %49 = vector.broadcast %48 : vector<1x32xf32> to vector<16x32xf32>
    %50 = arith.addf %46, %49 : vector<16x32xf32>
    %51 = arith.addf %30, %50 : vector<16x32xf32>
    %cst_37 = arith.constant 0.000000e+00 : f32
    %52 = vector.broadcast %cst_37 : f32 to vector<16x32xf32>
    %53 = arith.maximumf %51, %52 : vector<16x32xf32>
    %54 = arith.truncf %53 : vector<16x32xf32> to vector<16x32xbf16>
    %c0_38 = arith.constant 0 : index
    %c0_39 = arith.constant 0 : index
    %55 = vector.load %arg8[%c0_38, %c0_39] : memref<32x8xbf16, #tpu.memory_space<vmem>>, vector<32x8xbf16>
    %cst_40 = arith.constant dense<0.000000e+00> : vector<16x8xf32>
    %56 = tpu.matmul %54, %55, %cst_40 {dimension_numbers = #tpu.dot_dimension_numbers<[1], [0], [0], [1], [0, 0, 1, 1], [], []>} : vector<16x32xbf16>, vector<32x8xbf16>, vector<16x8xf32> -> vector<16x8xf32>
    %c0_41 = arith.constant 0 : index
    %c0_42 = arith.constant 0 : index
    %57 = vector.load %arg9[%c0_41, %c0_42] : memref<1x8xf32, #tpu.memory_space<vmem>>, vector<1x8xf32>
    %58 = vector.broadcast %57 : vector<1x8xf32> to vector<16x8xf32>
    %59 = arith.addf %56, %58 : vector<16x8xf32>
    %c0_43 = arith.constant 0 : index
    %c0_44 = arith.constant 0 : index
    %60 = vector.load %arg10[%c0_43, %c0_44] : memref<32x8xbf16, #tpu.memory_space<vmem>>, vector<32x8xbf16>
    %cst_45 = arith.constant dense<0.000000e+00> : vector<16x8xf32>
    %61 = tpu.matmul %54, %60, %cst_45 {dimension_numbers = #tpu.dot_dimension_numbers<[1], [0], [0], [1], [0, 0, 1, 1], [], []>} : vector<16x32xbf16>, vector<32x8xbf16>, vector<16x8xf32> -> vector<16x8xf32>
    %c0_46 = arith.constant 0 : index
    %c0_47 = arith.constant 0 : index
    %62 = vector.load %arg11[%c0_46, %c0_47] : memref<1x8xf32, #tpu.memory_space<vmem>>, vector<1x8xf32>
    %63 = vector.broadcast %62 : vector<1x8xf32> to vector<16x8xf32>
    %64 = arith.addf %61, %63 : vector<16x8xf32>
    %65 = arith.mulf %59, %59 : vector<16x8xf32>
    %66 = arith.mulf %64, %64 : vector<16x8xf32>
    %67 = arith.addf %65, %66 : vector<16x8xf32>
    %cst_48 = arith.constant 9.99999993E-9 : f32
    %68 = vector.broadcast %cst_48 : f32 to vector<16x8xf32>
    %69 = arith.maximumf %67, %68 : vector<16x8xf32>
    %70 = math.rsqrt %69 : vector<16x8xf32>
    %71 = arith.mulf %59, %70 : vector<16x8xf32>
    %c0_49 = arith.constant 0 : index
    %c0_50 = arith.constant 0 : index
    %72 = vector.load %arg12[%c0_49, %c0_50] : memref<16x16xf32, #tpu.memory_space<vmem>>, vector<16x8xf32>
    tpu.vector_store %arg12[%c0_49, %c0_50], %59 {strides = array<i32>} : memref<16x16xf32, #tpu.memory_space<vmem>>, vector<16x8xf32>,
    %c0_51 = arith.constant 0 : index
    %c8 = arith.constant 8 : index
    %73 = vector.load %arg12[%c0_51, %c8] : memref<16x16xf32, #tpu.memory_space<vmem>>, vector<16x8xf32>
    tpu.vector_store %arg12[%c0_51, %c8], %71 {strides = array<i32>} : memref<16x16xf32, #tpu.memory_space<vmem>>, vector<16x8xf32>,
    return
  }
  func.func @transform_0(%arg0: i32) -> (i32, i32) {
    %c0_i32 = arith.constant 0 : i32
    %c0_i32_0 = arith.constant 0 : i32
    return %arg0, %c0_i32 : i32, i32
  }
  func.func @transform_1(%arg0: i32) -> (i32, i32) {
    %c0_i32 = arith.constant 0 : i32
    %c0_i32_0 = arith.constant 0 : i32
    %c0_i32_1 = arith.constant 0 : i32
    return %c0_i32, %c0_i32_0 : i32, i32
  }
  func.func @transform_2(%arg0: i32) -> (i32, i32) {
    %c0_i32 = arith.constant 0 : i32
    %c0_i32_0 = arith.constant 0 : i32
    %c0_i32_1 = arith.constant 0 : i32
    return %c0_i32, %c0_i32_0 : i32, i32
  }
  func.func @transform_3(%arg0: i32) -> (i32, i32, i32) {
    %c0_i32 = arith.constant 0 : i32
    %c0_i32_0 = arith.constant 0 : i32
    %c0_i32_1 = arith.constant 0 : i32
    %c0_i32_2 = arith.constant 0 : i32
    return %c0_i32, %c0_i32_0, %c0_i32_1 : i32, i32, i32
  }
  func.func @transform_4(%arg0: i32) -> (i32, i32, i32) {
    %c0_i32 = arith.constant 0 : i32
    %c0_i32_0 = arith.constant 0 : i32
    %c0_i32_1 = arith.constant 0 : i32
    %c0_i32_2 = arith.constant 0 : i32
    return %c0_i32, %c0_i32_0, %c0_i32_1 : i32, i32, i32
  }
  func.func @transform_5(%arg0: i32) -> (i32, i32, i32) {
    %c0_i32 = arith.constant 0 : i32
    %c0_i32_0 = arith.constant 0 : i32
    %c0_i32_1 = arith.constant 0 : i32
    %c0_i32_2 = arith.constant 0 : i32
    return %c0_i32, %c0_i32_0, %c0_i32_1 : i32, i32, i32
  }
  func.func @transform_6(%arg0: i32) -> (i32, i32, i32) {
    %c0_i32 = arith.constant 0 : i32
    %c0_i32_0 = arith.constant 0 : i32
    %c0_i32_1 = arith.constant 0 : i32
    %c0_i32_2 = arith.constant 0 : i32
    return %c0_i32, %c0_i32_0, %c0_i32_1 : i32, i32, i32
  }
  func.func @transform_7(%arg0: i32) -> (i32, i32) {
    %c0_i32 = arith.constant 0 : i32
    %c0_i32_0 = arith.constant 0 : i32
    %c0_i32_1 = arith.constant 0 : i32
    return %c0_i32, %c0_i32_0 : i32, i32
  }
  func.func @transform_8(%arg0: i32) -> (i32, i32) {
    %c0_i32 = arith.constant 0 : i32
    %c0_i32_0 = arith.constant 0 : i32
    %c0_i32_1 = arith.constant 0 : i32
    return %c0_i32, %c0_i32_0 : i32, i32
  }
  func.func @transform_9(%arg0: i32) -> (i32, i32) {
    %c0_i32 = arith.constant 0 : i32
    %c0_i32_0 = arith.constant 0 : i32
    %c0_i32_1 = arith.constant 0 : i32
    return %c0_i32, %c0_i32_0 : i32, i32
  }
  func.func @transform_10(%arg0: i32) -> (i32, i32) {
    %c0_i32 = arith.constant 0 : i32
    %c0_i32_0 = arith.constant 0 : i32
    %c0_i32_1 = arith.constant 0 : i32
    return %c0_i32, %c0_i32_0 : i32, i32
  }
  func.func @transform_11(%arg0: i32) -> (i32, i32) {
    %c0_i32 = arith.constant 0 : i32
    %c0_i32_0 = arith.constant 0 : i32
    return %arg0, %c0_i32 : i32, i32
  }
}

</mosaic_0001>

<bundles_post_ra>
// kernel: tpu_custom_call.1
= control target key start
LH: loop header
LB: loop body
LE: loop exit
PB: predicated region body
PF: predicated region fallthrough
CT: control target
= control target key end

     0   :  { %16 = vsyncpa [#allocation3], 0  ;;  %s1024_s0 = inlined_call_operand.vmem [shape: bf16[16,64], index: 0, kind: input, shape index: {}]   ;;  %s1025_s1 = inlined_call_operand.vmem [shape: bf16[64,32], index: 1, kind: input, shape index: {}]   ;;  %s1026_s2 = inlined_call_operand.hbm [shape: f32[1,32], index: 2, kind: input, shape index: {}]   ;;  %s1027_s3 = inlined_call_operand.vmem [shape: bf16[2,32,32], index: 3, kind: input, shape index: {}]   ;;  %s1028_s4 = inlined_call_operand.hbm [shape: f32[2,1,32], index: 4, kind: input, shape index: {}]   ;;  %s1029_s5 = inlined_call_operand.vmem [shape: bf16[2,32,32], index: 5, kind: input, shape index: {}]   ;;  %s1030_s6 = inlined_call_operand.vmem [shape: f32[2,1,32], index: 6, kind: input, shape index: {}]   ;;  %s1031_s7 = inlined_call_operand.vmem [shape: bf16[32,8], index: 7, kind: input, shape index: {}]   ;;  %s1032_s8 = inlined_call_operand.vmem [shape: f32[1,8], index: 8, kind: input, shape index: {}]   ;;  %s1033_s9 = inlined_call_operand.vmem [shape: bf16[32,8], index: 9, kind: input, shape index: {}]   ;;  %s1034_s10 = inlined_call_operand.vmem [shape: f32[1,8], index: 10, kind: input, shape index: {}]   ;;  %s1035_s11 = inlined_call_operand.hbm [shape: f32[16,16], index: 11, kind: output, shape index: {}]  }
   0x1   :  { %17 = vsyncpa [#allocation6], 0 }
   0x2   :  { %18 = vsyncpa [#allocation4], 0  ;;  %s845_s17 = smov [#allocation2]   ;;  %s846_s19 = smov [#allocation5]  }
   0x3   :  { %s29_s18 = sshll.u32 %s845_s17, 4  ;;  %s40_s20 = sshll.u32 %s846_s19, 4  ;;  %s30_s18 = int_to_ptr.vmem [resolvable:$true] %s29_s18  ;;  %s41_s20 = int_to_ptr.vmem [resolvable:$true] %s40_s20 }
   0x4   :  { %s787_s21 = scalar_lea.vmem %s30_s18, 16  ;;  %s791_s22 = scalar_lea.vmem %s30_s18, 32 }
   0x5   :  { %p788_p0 = scmp.ne.s32.totalorder %s30_s18, %s787_s21  ;;  %p792_p1 = scmp.lt.s32.totalorder %s30_s18, %s30_s18 }
   0x6   :  { %p793_p2 = scmp.lt.s32.totalorder %s791_s22, %s787_s21 }
   0x8   :  { %p794_p3 = por %p793_p2, %p792_p1 }
   0xa   :  { %p795_p4 = pnand %p794_p3, %p788_p0 }
   0xc   :  { %798 = shalt.err (!%p795_p4)
}
   0xd   :  { %32 = dma.hbm_to_vmem [thread:$0]  %s1026_s2, 16, %s30_s18, [#allocation3]  }
   0xe   :  { %s807_s25 = scalar_lea.vmem %s41_s20, 32  ;;  %p812_p6 = scmp.lt.s32.totalorder %s41_s20, %s41_s20 }
   0xf   :  { %p808_p5 = scmp.ne.s32.totalorder %s41_s20, %s807_s25  ;;  %p813_p7 = scmp.lt.s32.totalorder %s807_s25, %s807_s25 }
  0x11   :  { %p814_p8 = por %p813_p7, %p812_p6 }
  0x13   :  { %p815_p9 = pnand %p814_p8, %p808_p5 }
  0x15   :  { %818 = shalt.err (!%p815_p9)
}
  0x16   :  { %s847_s26 = smov 16   ;;  %s848_s27 = smov 1  }
  0x17   :  { %46 = dma.hbm_to_vmem [thread:$0]  %s1028_s4, 32, %s41_s20, [#allocation6], %s847_s26, %s847_s26, %s848_s27  }
  0x18   :  { %839 = dma.done.wait [#allocation3], 16  }
  0x19   :  { %840 = vsyncadd [#allocation3], 4294967280 }
  0x1a   :  { %841 = dma.done.wait [#allocation6], 32  }
  0x1b   :  { %842 = vsyncadd [#allocation6], 4294967264  ;;  %v849_v0 = vmov 0.0   ;;  %vm850_vm0 = vmmov 0   ;;  %v759_v1 = vld [vmem:[%s1025_s1 + $0x18] sm:$0xff]   ;;  %v760_v2 = vld [vmem:[%s1025_s1 + $0x10] sm:$0xff]  }
  0x1c   :  { %690 = vmatprep.subr.bf16.mxu0 %v849_v0  ;;  %698 = vmatprep.mubr.msk.bf16.mxu0 %vm850_vm0, %v849_v0  ;;  %v761_v3 = vld [vmem:[%s1025_s1 + $0x8] sm:$0xff]   ;;  %v664_v4 = vld [vmem:[%s1024_s0] sm:$0xff]   ;;  %vm112_vm1 = vcmask 523264   ;;  %vm183_vm2 = vcmask 261120   ;;  %v767_v35 = vld [vmem:[%s1027_s3 + $0x18] sm:$0xff]   ;;  %vm592_vm3 = vcmask 64512  }
  0x1d   :  { %702 = vmatprep.subr.bf16.mxu1 %v849_v0  ;;  %706 = vmatprep.mubr.msk.bf16.mxu1 %vm850_vm0, %v849_v0  ;;  %v665_v5 = vunpack.c.l.bf16 %v664_v4  ;;  %v666_v6 = vunpack.c.h.bf16 %v664_v4  ;;  %v762_v9 = vld [vmem:[%s1025_s1] sm:$0xff]   ;;  %v763_v11 = vld [vmem:[%s1027_s3 + $0x8] sm:$0xff]   ;;  %v768_v36 = vld [vmem:[%s1027_s3 + $0x10] sm:$0xff]   ;;  %vm603_vm4 = vcmask 130112  }
  0x1e   :  { %691 = vmatpush3.bf16.msra.mxu0 %v759_v1  ;;  %703 = vmatpush3.bf16.msra.mxu1 %v763_v11  ;;  %v764_v12 = vld [vmem:[%s1027_s3] sm:$0xff]   ;;  %v765_v23 = vld [vmem:[%s1029_s5 + $0x8] sm:$0xff]   ;;  %v769_v49 = vld [vmem:[%s1029_s5 + $0x18] sm:$0xff]  }
  0x1f   :  { %692 = vmatprep.subr.bf16.mxu0 %v849_v0  ;;  %v70_v7 = vmax.f32 %v665_v5, 0.0  ;;  %v71_v8 = vmax.f32 %v666_v6, 0.0  ;;  %704 = vmatprep.subr.bf16.mxu1 %v849_v0  ;;  %v624_v13 = vld [vmem:[#allocation2] ss:$0 sm:$0xff]  ;;  %v630_v25 = vld [vmem:[#allocation5] ss:$0 sm:$0xff] }
  0x20   :  { %v766_v24 = vld [vmem:[%s1029_s5] sm:$0xff]   ;;  %v770_v50 = vld [vmem:[%s1029_s5 + $0x10] sm:$0xff]   ;;  %v771_v61 = vld [vmem:[%s1031_s7 + $0x8] sm:$0xff]  }
  0x21   :  { %v72_v10 = vpack.c.bf16 %v71_v8, %v70_v7  ;;  %v634_v37 = vld [vmem:[%s1030_s6] ss:$0 sm:$0xff]  ;;  %v642_v51 = vld [vmem:[#allocation5 + $0x1] ss:$0 sm:$0xff]  ;;  %v772_v62 = vld [vmem:[%s1033_s9 + $0x8] sm:$0xff]  }
  0x22   :  { %693 = vmatpush3.bf16.msra.mxu0 %v760_v2  ;;  %705 = vmatpush3.bf16.msra.mxu1 %v764_v12  ;;  %v773_v63 = vld [vmem:[%s1031_s7] sm:$0xff]  }
  0x23   :  { %694 = vmatprep.subr.bf16.mxu0 %v849_v0  ;;  %710 = vmatprep.subr.bf16.mxu1 %v849_v0  ;;  %v774_v1 = vld [vmem:[%s1033_s9] sm:$0xff]  }
  0x24   :  { %v651_v2 = vld [vmem:[%s1030_s6 + $0x1] ss:$0 sm:$0xff] }
  0x26   :  { %695 = vmatpush3.bf16.msra.mxu0 %v761_v3 }
  0x27   :  { %696 = vmatprep.subr.bf16.mxu0 %v849_v0 }
  0x2a   :  { %697 = vmatpush3.bf16.msra.mxu0 %v762_v9 }
  0x2b   :  { %718 = vmatprep.subr.bf16.mxu0 %v849_v0 }
  0x2d   :  { %699 = vmatmul.mubr.msk.bf16.vlgmr.msra.gmra.mxu0 %vm112_vm1, %v72_v10 }
  0x2e   :  { %722 = vmatprep.mubr.msk.bf16.mxu0 %vm850_vm0, %v849_v0  ;;  %719 = vmatpush3.bf16.msra.mxu0 %v767_v35 }
  0x2f   :  { %720 = vmatprep.subr.bf16.mxu0 %v849_v0 }
  0x32   :  { %721 = vmatpush3.bf16.msra.mxu0 %v768_v36 }
  0x33   :  { %734 = vmatprep.subr.bf16.mxu0 %v849_v0 }
  0xed   :  { %v150_v14 = vpop.f32.mrf.mxu0 }
  0xee   :  { %v151_v16 = vadd.f32 %v624_v13, %v150_v14  ;;  %v659_v14 = vld [vmem:[%s1034_s10] ss:$0 sm:$0xff]  ;;  %s852_s10 = smov [#allocation7]  }
  0xef   :  { %v700_v15 = vpop.f32.mrf.mxu0  ;;  %s611_s21 = sshll.u32 %s852_s10, 4  ;;  %s612_s21 = int_to_ptr.vmem [resolvable:$true] %s611_s21 }
  0xf0   :  { %v157_v20 = vmax.f32 %v151_v16, 0.0  ;;  %s819_s22 = scalar_lea.vmem %s612_s21, 256  ;;  %p824_p11 = scmp.lt.s32.totalorder %s612_s21, %s612_s21 }
  0xf1   :  { %v153_v17 = vpop.f32.mrf.mxu0  ;;  %p820_p10 = scmp.ne.s32.totalorder %s612_s21, %s819_s22  ;;  %p825_p12 = scmp.lt.s32.totalorder %s819_s22, %s819_s22 }
  0xf2   :  { %v154_v18 = vadd.f32 %v624_v13, %v153_v17  ;;  %v655_v13 = vld [vmem:[%s1032_s8] ss:$0 sm:$0xff]  ;;  %s851_s8 = smov 8  }
  0xf3   :  { %v701_v19 = vpop.f32.mrf.mxu0  ;;  %p826_p13 = por %p825_p12, %p824_p11 }
  0xf4   :  { %v158_v21 = vmax.f32 %v154_v18, 0.0 }
  0xf5   :  { %p827_p0 = pnand %p826_p13, %p820_p10 }
  0xf6   :  { %v159_v22 = vpack.c.bf16 %v158_v21, %v157_v20 }
  0xf8   :  { %707 = vmatmul.mubr.msk.bf16.vlgmr.msra.gmra.mxu1 %vm183_vm2, %v159_v22 }
  0xf9   :  { %714 = vmatprep.mubr.msk.bf16.mxu1 %vm850_vm0, %v849_v0  ;;  %711 = vmatpush3.bf16.msra.mxu1 %v765_v23 }
  0xfa   :  { %712 = vmatprep.subr.bf16.mxu1 %v849_v0 }
  0xfd   :  { %713 = vmatpush3.bf16.msra.mxu1 %v766_v24 }
  0xfe   :  { %726 = vmatprep.subr.bf16.mxu1 %v849_v0 }
 0x1b8   :  { %v221_v26 = vpop.f32.mrf.mxu1 }
 0x1b9   :  { %v222_v28 = vadd.f32 %v630_v25, %v221_v26 }
 0x1ba   :  { %v708_v27 = vpop.f32.mrf.mxu1 }
 0x1bb   :  { %v228_v32 = vmax.f32 %v222_v28, 0.0 }
 0x1bc   :  { %v224_v29 = vpop.f32.mrf.mxu1 }
 0x1bd   :  { %v225_v30 = vadd.f32 %v630_v25, %v224_v29 }
 0x1be   :  { %v709_v31 = vpop.f32.mrf.mxu1 }
 0x1bf   :  { %v229_v33 = vmax.f32 %v225_v30, 0.0 }
 0x1c1   :  { %v230_v34 = vpack.c.bf16 %v229_v33, %v228_v32 }
 0x1c3   :  { %715 = vmatmul.mubr.msk.bf16.vlgmr.msra.gmra.mxu1 %vm183_vm2, %v230_v34 }
 0x1c4   :  { %730 = vmatprep.mubr.msk.bf16.mxu1 %vm850_vm0, %v849_v0  ;;  %727 = vmatpush3.bf16.msra.mxu1 %v769_v49 }
 0x1c5   :  { %728 = vmatprep.subr.bf16.mxu1 %v849_v0 }
 0x1c8   :  { %729 = vmatpush3.bf16.msra.mxu1 %v770_v50 }
 0x1c9   :  { %742 = vmatprep.subr.bf16.mxu1 %v849_v0 }
 0x283   :  { %v291_v38 = vpop.f32.mrf.mxu1 }
 0x284   :  { %v292_v39 = vadd.f32 %v634_v37, %v291_v38 }
 0x285   :  { %v716_v40 = vpop.f32.mrf.mxu1 }
 0x286   :  { %v298_v42 = vadd.f32 %v292_v39, %v151_v16 }
 0x287   :  { %v294_v41 = vpop.f32.mrf.mxu1 }
 0x288   :  { %v295_v43 = vadd.f32 %v634_v37, %v294_v41  ;;  %v300_v46 = vmax.f32 %v298_v42, 0.0 }
 0x289   :  { %v717_v44 = vpop.f32.mrf.mxu1 }
 0x28a   :  { %v299_v45 = vadd.f32 %v295_v43, %v154_v18 }
 0x28c   :  { %v301_v47 = vmax.f32 %v299_v45, 0.0 }
 0x28e   :  { %v302_v48 = vpack.c.bf16 %v301_v47, %v300_v46 }
 0x290   :  { %723 = vmatmul.mubr.msk.bf16.vlgmr.msra.gmra.mxu0 %vm183_vm2, %v302_v48 }
 0x291   :  { %738 = vmatprep.mubr.msk.bf16.mxu0 %vm850_vm0, %v849_v0  ;;  %735 = vmatpush3.bf16.msra.mxu0 %v771_v61 }
 0x292   :  { %736 = vmatprep.subr.bf16.mxu0 %v849_v0 }
 0x295   :  { %737 = vmatpush3.bf16.msra.mxu0 %v773_v63 }
 0x350   :  { %v365_v52 = vpop.f32.mrf.mxu0 }
 0x351   :  { %v366_v54 = vadd.f32 %v642_v51, %v365_v52 }
 0x352   :  { %v724_v53 = vpop.f32.mrf.mxu0 }
 0x353   :  { %v372_v58 = vmax.f32 %v366_v54, 0.0 }
 0x354   :  { %v368_v55 = vpop.f32.mrf.mxu0 }
 0x355   :  { %v369_v56 = vadd.f32 %v642_v51, %v368_v55 }
 0x356   :  { %v725_v57 = vpop.f32.mrf.mxu0 }
 0x357   :  { %v373_v59 = vmax.f32 %v369_v56, 0.0 }
 0x359   :  { %v374_v60 = vpack.c.bf16 %v373_v59, %v372_v58 }
 0x35b   :  { %731 = vmatmul.mubr.msk.bf16.vlgmr.msra.gmra.mxu1 %vm183_vm2, %v374_v60 }
 0x35c   :  { %746 = vmatprep.mubr.msk.bf16.mxu1 %vm850_vm0, %v849_v0  ;;  %743 = vmatpush3.bf16.msra.mxu1 %v772_v62 }
 0x35d   :  { %744 = vmatprep.subr.bf16.mxu1 %v849_v0 }
 0x360   :  { %745 = vmatpush3.bf16.msra.mxu1 %v774_v1 }
 0x41b   :  { %v437_v3 = vpop.f32.mrf.mxu1 }
 0x41c   :  { %v438_v4 = vadd.f32 %v651_v2, %v437_v3 }
 0x41d   :  { %v732_v5 = vpop.f32.mrf.mxu1 }
 0x41e   :  { %v444_v7 = vadd.f32 %v438_v4, %v298_v42 }
 0x41f   :  { %v440_v6 = vpop.f32.mrf.mxu1 }
 0x420   :  { %v441_v0 = vadd.f32 %v651_v2, %v440_v6  ;;  %v446_v10 = vmax.f32 %v444_v7, 0.0 }
 0x421   :  { %v733_v8 = vpop.f32.mrf.mxu1 }
 0x422   :  { %v445_v9 = vadd.f32 %v441_v0, %v299_v45 }
 0x424   :  { %v447_v11 = vmax.f32 %v445_v9, 0.0 }
 0x426   :  { %v448_v12 = vpack.c.bf16 %v447_v11, %v446_v10 }
 0x428   :  { %739 = vmatmul.mubr.msk.bf16.vlgmr.msra.gmra.mxu0 %vm183_vm2, %v448_v12  ;;  %747 = vmatmul.mubr.msk.bf16.vlgmr.msra.gmra.mxu1 %vm183_vm2, %v448_v12 }
 0x4e8   :  { %v509_v15 = vpop.f32.mrf.mxu0  ;;  %v573_v16 = vpop.f32.mrf.mxu1 }
 0x4e9   :  { %v510_v17 = vadd.f32 %v655_v13, %v509_v15  ;;  %v574_v18 = vadd.f32 %v659_v14, %v573_v16 }
 0x4ea   :  { %v740_v19 = vpop.f32.mrf.mxu0  ;;  %v748_v20 = vpop.f32.mrf.mxu1 }
 0x4eb   :  { %593 = vst.msk [vmem:[#allocation7] sm:$0xff] %vm592_vm3, %v510_v17  ;;  %v580_v21 = vmul.f32 %v510_v17, %v510_v17  ;;  %v582_v22 = vmul.f32 %v574_v18, %v574_v18 }
 0x4ec   :  { %v512_v23 = vpop.f32.mrf.mxu0  ;;  %v576_v24 = vpop.f32.mrf.mxu1 }
 0x4ed   :  { %v584_v25 = vadd.f32 %v582_v22, %v580_v21  ;;  %v513_v26 = vadd.f32 %v655_v13, %v512_v23  ;;  %v577_v27 = vadd.f32 %v659_v14, %v576_v24 }
 0x4ee   :  { %v741_v28 = vpop.f32.mrf.mxu0  ;;  %v749_v29 = vpop.f32.mrf.mxu1 }
 0x4ef   :  { %v586_v30 = vmax.f32 %v584_v25, 1e-08  ;;  %594 = vst.msk [vmem:[#allocation7 + $0x8] sm:$0xff] %vm592_vm3, %v513_v26  ;;  %v581_v31 = vmul.f32 %v513_v26, %v513_v26  ;;  %v583_v32 = vmul.f32 %v577_v27, %v577_v27 }
 0x4f1   :  { %775 = vrsqrt.f32 %v586_v30  ;;  %v585_v33 = vadd.f32 %v583_v32, %v581_v31 }
 0x4f3   :  { %v587_v34 = vmax.f32 %v585_v33, 1e-08 }
 0x4f5   :  { %777 = vrsqrt.f32 %v587_v34 }
 0x4fe   :  { %v776_v35 = vpop.eup %775 }
 0x4ff   :  { %v590_v36 = vmul.f32 %v776_v35, %v510_v17 }
 0x501   :  { %597 = vrot.lane.b32.xlu0 %v590_v36, %s851_s8 }
 0x502   :  { %v778_v37 = vpop.eup %777 }
 0x503   :  { %v591_v38 = vmul.f32 %v778_v37, %v513_v26 }
 0x505   :  { %599 = vrot.lane.b32.xlu0 %v591_v38, %s851_s8 }
 0x573   :  { %v598_v39 = vpop.permute.xlu0 %597 }
 0x574   :  { %604 = vst.msk [vmem:[#allocation7] sm:$0xff] %vm603_vm4, %v598_v39 }
 0x577   :  { %v600_v40 = vpop.permute.xlu0 %599 }
 0x578   :  { %605 = vst.msk [vmem:[#allocation7 + $0x8] sm:$0xff] %vm603_vm4, %v600_v40 }
 0x579   :  { %830 = shalt.err (!%p827_p0)
}
 0x57a   :  { %s853_s23 = smov 128  }
 0x57b   :  { %617 = dma.vmem_to_hbm [thread:$0]  %s612_s21, 256, %s1035_s11, [#allocation4], %s853_s23, %s853_s23, %s851_s8  }
 0x57c   :  { %843 = dma.done.wait [#allocation4], 256  }
 0x57d   :  { %844 = vsyncadd [#allocation4], 4294967040 }
 0x57e   :  { %621 = vsyncpa [#allocation3], 1 }
 0x57f   :  { %622 = vsyncpa [#allocation6], 1 }
 0x580   :  { %623 = vsyncpa [#allocation4], 1 }

</bundles_post_ra>
